<compile_context>
chip_gen: v7x
topology: tpu7x:2x2x1
jax: 0.10.0
libtpu: 0.0.40
codegen_flags: <defaults>
</compile_context>

<pallas_src>
import functools

import jax
import jax.numpy as jnp
from jax import lax
from jax.experimental import pallas as pl
from jax.experimental.pallas import tpu as pltpu

LANES = 128
MAX_ROW_TILE = 1024   # f32 tile = 1024*128*4 B = 512 KiB per input
NUM_CORES = 2         # leading parallel grid axis (v7x megacore); serial elsewhere


def _dice_partials_kernel(x_ref, t_ref, o_ref, inter_acc, in_acc, tg_acc, *,
                          row_tile, tiles_per_core, total_elems, need_mask):
    c = pl.program_id(0)          # core / parallel axis
    j = pl.program_id(1)          # reduction sweep over row-tiles ("arbitrary")

    @pl.when(j == 0)
    def _():
        inter_acc[...] = jnp.zeros_like(inter_acc)
        in_acc[...] = jnp.zeros_like(in_acc)
        tg_acc[...] = jnp.zeros_like(tg_acc)

    x = x_ref[...].astype(jnp.float32)
    t = t_ref[...].astype(jnp.float32)

    # sigmoid: exp + reciprocal both routed to the EUP (approx reciprocal keeps
    # the VALU slots free for loads / muls / accumulator adds).
    s = pl.reciprocal(1.0 + jnp.exp(-x), approx=True)

    if need_mask:
        # Static: only emitted when tiles*row_tile*128 > numel. Masks edge-block
        # garbage / lane padding by global flat index (one compare + two selects).
        base_row = (c * tiles_per_core + j) * row_tile
        rid = base_row + lax.broadcasted_iota(jnp.int32, (row_tile, LANES), 0)
        lid = lax.broadcasted_iota(jnp.int32, (row_tile, LANES), 1)
        valid = (rid * LANES + lid) < total_elems
        s = jnp.where(valid, s, 0.0)
        t = jnp.where(valid, t, 0.0)

    # Vector accumulation: fold (row_tile,128) -> (8,128) with leading-axis adds
    # (pure VALU); no cross-lane XLU work inside the hot loop.
    k = row_tile // 8
    inter_acc[...] += jnp.sum((s * t).reshape(k, 8, LANES), axis=0)
    in_acc[...] += jnp.sum(s.reshape(k, 8, LANES), axis=0)
    tg_acc[...] += jnp.sum(t.reshape(k, 8, LANES), axis=0)

    # Epilogue: dump the per-core vector partials (lane-dense output block).
    @pl.when(j == pl.num_programs(1) - 1)
    def _():
        o_ref[0, 0, :, :] = inter_acc[...]
        o_ref[0, 1, :, :] = in_acc[...]
        o_ref[0, 2, :, :] = tg_acc[...]


def dice_loss(inputs, targets):
    """Pallas implementation of DiceLoss.forward(inputs, targets) -> scalar."""
    assert inputs.shape == targets.shape
    n = int(inputs.size)

    # Flatten in native dtype (no wrapper-side f32 upcast — kernel casts per tile).
    x_flat = jnp.ravel(inputs)
    t_flat = jnp.ravel(targets)

    rows = (n + LANES - 1) // LANES
    padded = rows * LANES
    if padded != n:
        # Only hit when numel % 128 != 0 (tiny pad); pad values are masked in-kernel.
        x_flat = jnp.pad(x_flat, (0, padded - n))
        t_flat = jnp.pad(t_flat, (0, padded - n))
    x2d = x_flat.reshape(rows, LANES)
    t2d = t_flat.reshape(rows, LANES)

    # Row tile: as large as allowed, multiple of 8 (sublane), capped for VMEM.
    row_tile = min(MAX_ROW_TILE, ((rows + 7) // 8) * 8)
    tiles = (rows + row_tile - 1) // row_tile

    # Split the tile sweep across TensorCores when it divides evenly (v7x wins).
    c_grid = NUM_CORES if (tiles % NUM_CORES == 0 and tiles >= NUM_CORES) else 1
    j_grid = tiles // c_grid

    need_mask = (tiles * row_tile * LANES) != n

    kernel = functools.partial(
        _dice_partials_kernel,
        row_tile=row_tile,
        tiles_per_core=j_grid,
        total_elems=n,
        need_mask=need_mask,
    )

    partials = pl.pallas_call(
        kernel,
        out_shape=jax.ShapeDtypeStruct((c_grid, 3, 8, LANES), jnp.float32),
        grid_spec=pltpu.PrefetchScalarGridSpec(
            num_scalar_prefetch=0,
            grid=(c_grid, j_grid),
            in_specs=[
                pl.BlockSpec((row_tile, LANES), lambda c, j: (c * j_grid + j, 0)),
                pl.BlockSpec((row_tile, LANES), lambda c, j: (c * j_grid + j, 0)),
            ],
            out_specs=pl.BlockSpec((1, 3, 8, LANES), lambda c, j: (c, 0, 0, 0)),
            scratch_shapes=[
                pltpu.VMEM((8, LANES), jnp.float32),  # sum(sigmoid(x) * t)
                pltpu.VMEM((8, LANES), jnp.float32),  # sum(sigmoid(x))
                pltpu.VMEM((8, LANES), jnp.float32),  # sum(t)
            ],
        ),
        compiler_params=pltpu.CompilerParams(
            dimension_semantics=("parallel", "arbitrary"),
        ),
    )(x2d, t2d)

    # Combine per-core vector partials and apply the dice formula (tiny XLA work).
    sums = jnp.sum(partials, axis=(0, 2, 3))  # [intersection, sum_sigmoid, sum_targets]
    dice = (2.0 * sums[0] + 1.0) / (sums[1] + sums[2] + 1.0)
    return 1.0 - dice


def dice_loss_ref(inputs, targets):
    s = jax.nn.sigmoid(inputs.astype(jnp.float32))
    t = targets.astype(jnp.float32)
    intersection = jnp.sum(s * t)
    dice = (2.0 * intersection + 1.0) / (jnp.sum(s) + jnp.sum(t) + 1.0)
    return 1.0 - dice


if __name__ == "__main__":
    key = jax.random.PRNGKey(0)
    k1, k2 = jax.random.split(key)

    # Small shapes consistent with the module's use (logit masks / binary targets).
    shape = (2, 4, 16, 16)  # N, C, H, W
    inputs = jax.random.normal(k1, shape, dtype=jnp.float32)
    targets = (jax.random.uniform(k2, shape) > 0.5).astype(jnp.float32)

    loss = dice_loss(inputs, targets)
    jax.block_until_ready(loss)

    ref = dice_loss_ref(inputs, targets)
    # The EUP approximate reciprocal in the in-kernel sigmoid introduces ~1e-4-level
    # relative error per element; allow a small tolerance accordingly.
    assert jnp.allclose(loss, ref, rtol=2e-3, atol=2e-3), (loss, ref)

    print("KERNEL_OK")
</pallas_src>

<mosaic_0001>
module attributes {stable_mosaic.version = 11 : i64} {
  func.func @_dice_partials_kernel(%arg0: i32, %arg1: i32, %arg2: memref<16x128xf32, #tpu.memory_space<vmem>>, %arg3: memref<16x128xf32, #tpu.memory_space<vmem>>, %arg4: memref<1x3x8x128xf32, #tpu.memory_space<vmem>>, %arg5: memref<8x128xf32, #tpu.memory_space<vmem>>, %arg6: memref<8x128xf32, #tpu.memory_space<vmem>>, %arg7: memref<8x128xf32, #tpu.memory_space<vmem>>) attributes {dimension_semantics = [#tpu.dimension_semantics<parallel>, #tpu.dimension_semantics<arbitrary>], iteration_bounds = array<i64: 1, 1>, scalar_prefetch = 0 : i64, scratch_operands = 3 : i64, tpu.core_type = #tpu.core_type<tc>, window_params = [{transform_indices = @transform_0, window_bounds = array<i64: 16, 128>}, {transform_indices = @transform_1, window_bounds = array<i64: 16, 128>}, {transform_indices = @transform_2, window_bounds = array<i64: 1, 3, 8, 128>}]} {
    %c0_i32 = arith.constant 0 : i32
    %0 = arith.cmpi eq, %arg1, %c0_i32 : i32
    %1 = arith.extui %0 : i1 to i32
    %c0_i32_0 = arith.constant 0 : i32
    %2 = arith.cmpi ne, %1, %c0_i32_0 : i32
    scf.if %2 {
      %cst_22 = arith.constant 0.000000e+00 : f32
      %30 = vector.broadcast %cst_22 : f32 to vector<8x128xf32>
      %c0_23 = arith.constant 0 : index
      %c0_24 = arith.constant 0 : index
      %31 = vector.load %arg5[%c0_23, %c0_24] : memref<8x128xf32, #tpu.memory_space<vmem>>, vector<8x128xf32>
      tpu.vector_store %arg5[%c0_23, %c0_24], %30 {strides = array<i32>} : memref<8x128xf32, #tpu.memory_space<vmem>>, vector<8x128xf32>,
      %cst_25 = arith.constant 0.000000e+00 : f32
      %32 = vector.broadcast %cst_25 : f32 to vector<8x128xf32>
      %c0_26 = arith.constant 0 : index
      %c0_27 = arith.constant 0 : index
      %33 = vector.load %arg6[%c0_26, %c0_27] : memref<8x128xf32, #tpu.memory_space<vmem>>, vector<8x128xf32>
      tpu.vector_store %arg6[%c0_26, %c0_27], %32 {strides = array<i32>} : memref<8x128xf32, #tpu.memory_space<vmem>>, vector<8x128xf32>,
      %cst_28 = arith.constant 0.000000e+00 : f32
      %34 = vector.broadcast %cst_28 : f32 to vector<8x128xf32>
      %c0_29 = arith.constant 0 : index
      %c0_30 = arith.constant 0 : index
      %35 = vector.load %arg7[%c0_29, %c0_30] : memref<8x128xf32, #tpu.memory_space<vmem>>, vector<8x128xf32>
      tpu.vector_store %arg7[%c0_29, %c0_30], %34 {strides = array<i32>} : memref<8x128xf32, #tpu.memory_space<vmem>>, vector<8x128xf32>,
    } else {
    }
    %c0 = arith.constant 0 : index
    %c0_1 = arith.constant 0 : index
    %3 = vector.load %arg2[%c0, %c0_1] : memref<16x128xf32, #tpu.memory_space<vmem>>, vector<16x128xf32>
    %c0_2 = arith.constant 0 : index
    %c0_3 = arith.constant 0 : index
    %4 = vector.load %arg3[%c0_2, %c0_3] : memref<16x128xf32, #tpu.memory_space<vmem>>, vector<16x128xf32>
    %cst = arith.constant 0.000000e+00 : f32
    %5 = vector.broadcast %cst : f32 to vector<16x128xf32>
    %6 = arith.subf %5, %3 : vector<16x128xf32>
    %7 = math.exp %6 : vector<16x128xf32>
    %cst_4 = arith.constant 1.000000e+00 : f32
    %8 = vector.broadcast %cst_4 : f32 to vector<16x128xf32>
    %9 = arith.addf %8, %7 : vector<16x128xf32>
    %10 = tpu.reciprocal %9 {approx = true} : vector<16x128xf32> -> vector<16x128xf32>
    %c0_5 = arith.constant 0 : index
    %c0_6 = arith.constant 0 : index
    %11 = vector.load %arg5[%c0_5, %c0_6] : memref<8x128xf32, #tpu.memory_space<vmem>>, vector<8x128xf32>
    %12 = arith.mulf %10, %4 : vector<16x128xf32>
    %13 = vector.shape_cast %12 : vector<16x128xf32> to vector<2x8x128xf32>
    %cst_7 = arith.constant dense<0.000000e+00> : vector<8x128xf32>
    %14 = vector.multi_reduction <add>, %13, %cst_7 [0] : vector<2x8x128xf32> to vector<8x128xf32>
    %15 = arith.addf %11, %14 : vector<8x128xf32>
    %c0_8 = arith.constant 0 : index
    %c0_9 = arith.constant 0 : index
    %16 = vector.load %arg5[%c0_8, %c0_9] : memref<8x128xf32, #tpu.memory_space<vmem>>, vector<8x128xf32>
    tpu.vector_store %arg5[%c0_8, %c0_9], %15 {strides = array<i32>} : memref<8x128xf32, #tpu.memory_space<vmem>>, vector<8x128xf32>,
    %c0_10 = arith.constant 0 : index
    %c0_11 = arith.constant 0 : index
    %17 = vector.load %arg6[%c0_10, %c0_11] : memref<8x128xf32, #tpu.memory_space<vmem>>, vector<8x128xf32>
    %18 = vector.shape_cast %10 : vector<16x128xf32> to vector<2x8x128xf32>
    %cst_12 = arith.constant dense<0.000000e+00> : vector<8x128xf32>
    %19 = vector.multi_reduction <add>, %18, %cst_12 [0] : vector<2x8x128xf32> to vector<8x128xf32>
    %20 = arith.addf %17, %19 : vector<8x128xf32>
    %c0_13 = arith.constant 0 : index
    %c0_14 = arith.constant 0 : index
    %21 = vector.load %arg6[%c0_13, %c0_14] : memref<8x128xf32, #tpu.memory_space<vmem>>, vector<8x128xf32>
    tpu.vector_store %arg6[%c0_13, %c0_14], %20 {strides = array<i32>} : memref<8x128xf32, #tpu.memory_space<vmem>>, vector<8x128xf32>,
    %c0_15 = arith.constant 0 : index
    %c0_16 = arith.constant 0 : index
    %22 = vector.load %arg7[%c0_15, %c0_16] : memref<8x128xf32, #tpu.memory_space<vmem>>, vector<8x128xf32>
    %23 = vector.shape_cast %4 : vector<16x128xf32> to vector<2x8x128xf32>
    %cst_17 = arith.constant dense<0.000000e+00> : vector<8x128xf32>
    %24 = vector.multi_reduction <add>, %23, %cst_17 [0] : vector<2x8x128xf32> to vector<8x128xf32>
    %25 = arith.addf %22, %24 : vector<8x128xf32>
    %c0_18 = arith.constant 0 : index
    %c0_19 = arith.constant 0 : index
    %26 = vector.load %arg7[%c0_18, %c0_19] : memref<8x128xf32, #tpu.memory_space<vmem>>, vector<8x128xf32>
    tpu.vector_store %arg7[%c0_18, %c0_19], %25 {strides = array<i32>} : memref<8x128xf32, #tpu.memory_space<vmem>>, vector<8x128xf32>,
    %c0_i32_20 = arith.constant 0 : i32
    %27 = arith.cmpi eq, %arg1, %c0_i32_20 : i32
    %28 = arith.extui %27 : i1 to i32
    %c0_i32_21 = arith.constant 0 : i32
    %29 = arith.cmpi ne, %28, %c0_i32_21 : i32
    scf.if %29 {
      %c0_22 = arith.constant 0 : index
      %c0_23 = arith.constant 0 : index
      %30 = vector.load %arg5[%c0_22, %c0_23] : memref<8x128xf32, #tpu.memory_space<vmem>>, vector<8x128xf32>
      %c0_24 = arith.constant 0 : index
      %c0_25 = arith.constant 0 : index
      %c0_26 = arith.constant 0 : index
      %c0_27 = arith.constant 0 : index
      %31 = vector.load %arg4[%c0_24, %c0_25, %c0_26, %c0_27] : memref<1x3x8x128xf32, #tpu.memory_space<vmem>>, vector<1x1x8x128xf32>
      %32 = vector.shape_cast %31 : vector<1x1x8x128xf32> to vector<8x128xf32>
      %33 = vector.shape_cast %30 : vector<8x128xf32> to vector<1x1x8x128xf32>
      tpu.vector_store %arg4[%c0_24, %c0_25, %c0_26, %c0_27], %33 {strides = array<i32>} : memref<1x3x8x128xf32, #tpu.memory_space<vmem>>, vector<1x1x8x128xf32>,
      %c0_28 = arith.constant 0 : index
      %c0_29 = arith.constant 0 : index
      %34 = vector.load %arg6[%c0_28, %c0_29] : memref<8x128xf32, #tpu.memory_space<vmem>>, vector<8x128xf32>
      %c0_30 = arith.constant 0 : index
      %c1 = arith.constant 1 : index
      %c0_31 = arith.constant 0 : index
      %c0_32 = arith.constant 0 : index
      %35 = vector.load %arg4[%c0_30, %c1, %c0_31, %c0_32] : memref<1x3x8x128xf32, #tpu.memory_space<vmem>>, vector<1x1x8x128xf32>
      %36 = vector.shape_cast %35 : vector<1x1x8x128xf32> to vector<8x128xf32>
      %37 = vector.shape_cast %34 : vector<8x128xf32> to vector<1x1x8x128xf32>
      tpu.vector_store %arg4[%c0_30, %c1, %c0_31, %c0_32], %37 {strides = array<i32>} : memref<1x3x8x128xf32, #tpu.memory_space<vmem>>, vector<1x1x8x128xf32>,
      %c0_33 = arith.constant 0 : index
      %c0_34 = arith.constant 0 : index
      %38 = vector.load %arg7[%c0_33, %c0_34] : memref<8x128xf32, #tpu.memory_space<vmem>>, vector<8x128xf32>
      %c0_35 = arith.constant 0 : index
      %c2 = arith.constant 2 : index
      %c0_36 = arith.constant 0 : index
      %c0_37 = arith.constant 0 : index
      %39 = vector.load %arg4[%c0_35, %c2, %c0_36, %c0_37] : memref<1x3x8x128xf32, #tpu.memory_space<vmem>>, vector<1x1x8x128xf32>
      %40 = vector.shape_cast %39 : vector<1x1x8x128xf32> to vector<8x128xf32>
      %41 = vector.shape_cast %38 : vector<8x128xf32> to vector<1x1x8x128xf32>
      tpu.vector_store %arg4[%c0_35, %c2, %c0_36, %c0_37], %41 {strides = array<i32>} : memref<1x3x8x128xf32, #tpu.memory_space<vmem>>, vector<1x1x8x128xf32>,
    } else {
    }
    return
  }
  func.func @transform_0(%arg0: i32, %arg1: i32) -> (i32, i32) {
    %c1_i32 = arith.constant 1 : i32
    %0 = arith.muli %arg0, %c1_i32 : i32
    %1 = arith.addi %0, %arg1 : i32
    %c0_i32 = arith.constant 0 : i32
    %c0_i32_0 = arith.constant 0 : i32
    return %1, %c0_i32 : i32, i32
  }
  func.func @transform_1(%arg0: i32, %arg1: i32) -> (i32, i32) {
    %c1_i32 = arith.constant 1 : i32
    %0 = arith.muli %arg0, %c1_i32 : i32
    %1 = arith.addi %0, %arg1 : i32
    %c0_i32 = arith.constant 0 : i32
    %c0_i32_0 = arith.constant 0 : i32
    return %1, %c0_i32 : i32, i32
  }
  func.func @transform_2(%arg0: i32, %arg1: i32) -> (i32, i32, i32, i32) {
    %c0_i32 = arith.constant 0 : i32
    %c0_i32_0 = arith.constant 0 : i32
    %c0_i32_1 = arith.constant 0 : i32
    %c0_i32_2 = arith.constant 0 : i32
    return %arg0, %c0_i32, %c0_i32_0, %c0_i32_1 : i32, i32, i32, i32
  }
}

</mosaic_0001>

<bundles_post_ra>
// kernel: tpu_custom_call.1
= control target key start
LH: loop header
LB: loop body
LE: loop exit
PB: predicated region body
PF: predicated region fallthrough
CT: control target
= control target key end

     0   :  { %7 = vsyncpa [#allocation6], 0  ;;  %s266_s0 = inlined_call_operand.hbm [shape: f32[16,128], index: 0, kind: input, shape index: {}]   ;;  %s267_s1 = inlined_call_operand.hbm [shape: f32[16,128], index: 1, kind: input, shape index: {}]   ;;  %s268_s2 = inlined_call_operand.hbm [shape: f32[1,3,8,128], index: 2, kind: output, shape index: {}]  }
   0x1   :  { %8 = vsyncpa [#allocation9], 0 }
   0x2   :  { %9 = vsyncpa [#allocation7], 0  ;;  %s201_s9 = smov [#allocation5]   ;;  %s129_s13 = scalar_lea.hbm %s266_s0, 256 }
   0x3   :  { %s19_s10 = sshll.u32 %s201_s9, 4  ;;  %p130_p0 = scmp.ne.s32.totalorder %s266_s0, %s129_s13  ;;  %s20_s10 = int_to_ptr.vmem [resolvable:$true] %s19_s10 }
   0x4   :  { %p133_p1 = scmp.lt.u32.totalorder %s129_s13, %s266_s0 }
   0x6   :  { %p135_p2 = pnand %p133_p1, %p130_p0 }
   0x8   :  { %138 = shalt.err (!%p135_p2)
}
   0x9   :  { %s139_s18 = scalar_lea.vmem %s20_s10, 256  ;;  %p144_p4 = scmp.lt.s32.totalorder %s20_s10, %s20_s10 }
   0xa   :  { %p140_p3 = scmp.ne.s32.totalorder %s20_s10, %s139_s18  ;;  %p145_p5 = scmp.lt.s32.totalorder %s139_s18, %s139_s18 }
   0xc   :  { %p146_p6 = por %p145_p5, %p144_p4 }
   0xe   :  { %p147_p7 = pnand %p146_p6, %p140_p3 }
  0x10   :  { %150 = shalt.err (!%p147_p7)
}
  0x11   :  { %s202_s19 = smov 128   ;;  %s203_s20 = smov 8  }
  0x12   :  { %25 = dma.hbm_to_vmem [thread:$0]  %s266_s0, 256, %s20_s10, [#allocation6], %s202_s19, %s202_s19, %s203_s20  }
  0x13   :  { %s204_s23 = smov [#allocation8]   ;;  %s151_s27 = scalar_lea.hbm %s267_s1, 256 }
  0x14   :  { %s35_s24 = sshll.u32 %s204_s23, 4  ;;  %p152_p8 = scmp.ne.s32.totalorder %s267_s1, %s151_s27  ;;  %s36_s24 = int_to_ptr.vmem [resolvable:$true] %s35_s24 }
  0x15   :  { %p155_p9 = scmp.lt.u32.totalorder %s151_s27, %s267_s1 }
  0x17   :  { %p157_p10 = pnand %p155_p9, %p152_p8 }
  0x19   :  { %160 = shalt.err (!%p157_p10)
}
  0x1a   :  { %s161_s4 = scalar_lea.vmem %s36_s24, 256  ;;  %p166_p12 = scmp.lt.s32.totalorder %s36_s24, %s36_s24 }
  0x1b   :  { %p162_p11 = scmp.ne.s32.totalorder %s36_s24, %s161_s4  ;;  %p167_p13 = scmp.lt.s32.totalorder %s161_s4, %s161_s4 }
  0x1d   :  { %p168_p0 = por %p167_p13, %p166_p12 }
  0x1f   :  { %p169_p1 = pnand %p168_p0, %p162_p11 }
  0x21   :  { %172 = shalt.err (!%p169_p1)
}
  0x22   :  { %41 = dma.hbm_to_vmem [thread:$0]  %s267_s1, 256, %s36_s24, [#allocation9], %s202_s19, %s202_s19, %s203_s20  }
  0x23   :  { %195 = dma.done.wait [#allocation6], 256  }
  0x24   :  { %196 = vsyncadd [#allocation6], 4294967040 }
  0x25   :  { %197 = dma.done.wait [#allocation9], 256  }
  0x26   :  { %198 = vsyncadd [#allocation9], 4294967040  ;;  %v59_v0 = vld [vmem:[#allocation5] sm:$0xff]  ;;  %v60_v1 = vld [vmem:[#allocation5 + $0x8] sm:$0xff]  ;;  %s205_s1 = smov [#allocation10]  }
  0x27   :  { %v61_v2 = vld [vmem:[#allocation8] sm:$0xff]  ;;  %v62_v3 = vld [vmem:[#allocation8 + $0x8] sm:$0xff]  ;;  %v63_v4 = vsub.f32 0.0, %v59_v0  ;;  %v64_v5 = vsub.f32 0.0, %v60_v1  ;;  %s103_s6 = sshll.u32 %s205_s1, 4  ;;  %s104_s6 = int_to_ptr.vmem [resolvable:$true] %s103_s6 }
  0x28   :  { %v84_v6 = vadd.f32 %v62_v3, %v61_v2  ;;  %s173_s7 = scalar_lea.vmem %s104_s6, 384  ;;  %p178_p3 = scmp.lt.s32.totalorder %s104_s6, %s104_s6 }
  0x29   :  { %v65_v7 = vmul.f32 1.442695, %v63_v4  ;;  %v67_v8 = vmul.f32 1.442695, %v64_v5  ;;  %p174_p2 = scmp.ne.s32.totalorder %s104_s6, %s173_s7  ;;  %p179_p4 = scmp.lt.s32.totalorder %s173_s7, %s173_s7 }
  0x2a   :  { %97 = vst [vmem:[#allocation10 + $0x10] sm:$0xff] %v84_v6 }
  0x2b   :  { %121 = vpow2.f32 %v65_v7  ;;  %p180_p5 = por %p179_p4, %p178_p3 }
  0x2c   :  { %123 = vpow2.f32 %v67_v8 }
  0x2d   :  { %p181_p6 = pnand %p180_p5, %p174_p2 }
  0x35   :  { %v122_v9 = vpop.eup %121 }
  0x36   :  { %v124_v10 = vpop.eup %123  ;;  %v69_v11 = vadd.f32 1.0, %v122_v9 }
  0x37   :  { %v70_v12 = vadd.f32 1.0, %v124_v10 }
  0x38   :  { %125 = vrcp.f32 %v69_v11 }
  0x39   :  { %127 = vrcp.f32 %v70_v12 }
  0x42   :  { %v126_v13 = vpop.eup %125 }
  0x43   :  { %v128_v14 = vpop.eup %127  ;;  %v74_v15 = vmul.f32 %v126_v13, %v61_v2 }
  0x44   :  { %v75_v16 = vmul.f32 %v128_v14, %v62_v3  ;;  %v80_v17 = vadd.f32 %v128_v14, %v126_v13 }
  0x46   :  { %v76_v18 = vadd.f32 %v75_v16, %v74_v15  ;;  %94 = vst [vmem:[#allocation10 + $0x8] sm:$0xff] %v80_v17 }
  0x48   :  { %91 = vst [vmem:[#allocation10] sm:$0xff] %v76_v18 }
  0x49   :  { %184 = shalt.err (!%p181_p6)
}
  0x4a   :  { %s185_s10 = scalar_lea.hbm %s268_s2, 384 }
  0x4b   :  { %p186_p7 = scmp.ne.s32.totalorder %s268_s2, %s185_s10  ;;  %p189_p8 = scmp.lt.u32.totalorder %s185_s10, %s268_s2 }
  0x4d   :  { %p191_p9 = pnand %p189_p8, %p186_p7 }
  0x4f   :  { %194 = shalt.err (!%p191_p9)
}
  0x50   :  { %109 = dma.vmem_to_hbm [thread:$0]  %s104_s6, 384, %s268_s2, [#allocation7], %s202_s19, %s202_s19, %s203_s20  }
  0x51   :  { %199 = dma.done.wait [#allocation7], 384  }
  0x52   :  { %200 = vsyncadd [#allocation7], 4294966912 }
  0x53   :  { %113 = vsyncpa [#allocation6], 1 }
  0x54   :  { %114 = vsyncpa [#allocation9], 1 }
  0x55   :  { %115 = vsyncpa [#allocation7], 1 }

</bundles_post_ra>
